<compile_context>
chip_gen: v6e
topology: v6e:2x2x1
jax: 0.10.0
libtpu: 0.0.40
codegen_flags: <defaults>
</compile_context>

<pallas_src>
import jax
import jax.numpy as jnp
from jax import lax
from jax.experimental import pallas as pl
from jax.experimental.pallas import tpu as pltpu


def _local_inference_kernel(p_ref, h_ref, mp_ref, mh_ref):
    bt, Lp, D = p_ref.shape
    Lh = h_ref.shape[1]
    out_dt = mp_ref.dtype

    # Hoisted out of the loop: JAX does not CSE broadcasts/constants per-iter.
    ones_col = jnp.ones((Lp, 1), dtype=jnp.float32)

    def body(b, carry):
        p = p_ref[b]                        # (Lp, D), input dtype
        h = h_ref[b]                        # (Lh, D), input dtype

        # e[i, j] = <p_i, h_j> -> (Lp, Lh); contract last dims directly,
        # no materialized transpose of h.
        e = lax.dot_general(p, h, (((1,), (1,)), ((), ())),
                            preferred_element_type=jnp.float32)

        # Per-row max for the Lh-softmax, per-column max for the Lp-softmax
        # (robust: no row/column can underflow relative to its own max).
        m_r = jnp.max(e, axis=1, keepdims=True)     # (Lp, 1)
        m_c = jnp.max(e, axis=0, keepdims=True)     # (1, Lh)

        ex_r = jnp.exp(e - m_r)                     # (Lp, Lh) f32, p-softmax numerator
        ex_c = jnp.exp(e - m_c)                     # (Lp, Lh) f32, h-softmax numerator

        # Denominators. Row sums via XLU lane-reduce -> (Lp, 1).
        s_r = jnp.sum(ex_r, axis=1, keepdims=True)
        # Column sums via a tiny MXU matmul with a ones column so the result
        # is born in (Lh, 1) layout (avoids a (1, Lh) -> (Lh, 1) relayout).
        s_c = lax.dot_general(ex_c, ones_col, (((0,), (0,)), ((), ())),
                              preferred_element_type=jnp.float32)   # (Lh, 1)

        # Normalization folded into post-matmul scaling: scale the (L, D)
        # attended results, not the (Lp, Lh) score matrices.  Numerators are
        # cast to the input dtype so the second MXU pass runs at bf16 rate
        # when inputs are bf16 (no-op for f32).
        p_att = lax.dot_general(ex_r.astype(h.dtype), h,
                                (((1,), (0,)), ((), ())),
                                preferred_element_type=jnp.float32)
        p_att = p_att * pl.reciprocal(s_r, approx=False)            # (Lp, D)

        # Contract over Lp directly: the score matrix is never transposed.
        h_att = lax.dot_general(ex_c.astype(p.dtype), p,
                                (((0,), (0,)), ((), ())),
                                preferred_element_type=jnp.float32)
        h_att = h_att * pl.reciprocal(s_c, approx=False)            # (Lh, D)

        p_f = p.astype(jnp.float32)
        h_f = h.astype(jnp.float32)

        if D % 128 == 0:
            # Four lane-aligned unmasked stores; no (L, 4D) staging buffer.
            mp_ref[b, :, 0 * D:1 * D] = p_f.astype(out_dt)
            mp_ref[b, :, 1 * D:2 * D] = p_att.astype(out_dt)
            mp_ref[b, :, 2 * D:3 * D] = (p_f - p_att).astype(out_dt)
            mp_ref[b, :, 3 * D:4 * D] = (p_f * p_att).astype(out_dt)
            mh_ref[b, :, 0 * D:1 * D] = h_f.astype(out_dt)
            mh_ref[b, :, 1 * D:2 * D] = h_att.astype(out_dt)
            mh_ref[b, :, 2 * D:3 * D] = (h_f - h_att).astype(out_dt)
            mh_ref[b, :, 3 * D:4 * D] = (h_f * h_att).astype(out_dt)
        else:
            # Single lane-dense (width 4*D) store; pieces pre-cast to the
            # output dtype so bf16 outputs only stage half the bytes.
            mp_ref[b] = jnp.concatenate(
                (p_f.astype(out_dt), p_att.astype(out_dt),
                 (p_f - p_att).astype(out_dt), (p_f * p_att).astype(out_dt)),
                axis=-1)
            mh_ref[b] = jnp.concatenate(
                (h_f.astype(out_dt), h_att.astype(out_dt),
                 (h_f - h_att).astype(out_dt), (h_f * h_att).astype(out_dt)),
                axis=-1)
        return carry

    if bt == 1:
        body(0, None)
    else:
        # fori_loop (not a Python unroll) bounds live ranges to one batch
        # element's Lp*Lh temporaries at a time.
        lax.fori_loop(0, bt, body, None)


def _tpu_vmem_bytes():
    """Physical per-core VMEM, with a conservative fallback (v7x = 64 MiB)."""
    try:
        return int(pltpu.get_tpu_info().vmem_capacity_bytes)
    except Exception:
        return 64 * 2**20


def _per_step_vmem_bytes(bt, Lp, Lh, D, itemsize):
    """Per-grid-step VMEM footprint (double-buffered I/O + live f32 temps).

    With the fori_loop body, only ONE batch element's temporaries are live at
    a time, so `tmp` is intentionally not multiplied by bt.
    """
    f32 = 4
    io = 2 * bt * (Lp + Lh) * D * itemsize            # inputs, 2 buffers each
    io += 2 * bt * (Lp + Lh) * 4 * D * itemsize       # outputs, 2 buffers each
    tmp = 3 * Lp * Lh * f32                           # e + ex_r + ex_c
    tmp += (Lp + Lh) * (D + 1) * f32                  # attended reps + sums
    tmp += (Lp + Lh) * 4 * D * itemsize               # concat staging (out dtype)
    return io + tmp


def _pick_batch_tile(B, Lp, Lh, D, itemsize, budget_bytes):
    """Pack several batch elements per grid step (amortizes the ~0.35us
    per-step overhead, larger DMAs), keeping >= 2 grid steps when B >= 2 so
    the parallel axis can still span both v7x TensorCores."""
    best = 1
    for d in range(1, B + 1):
        if B % d:
            continue
        if B > 1 and B // d < 2:
            continue
        if _per_step_vmem_bytes(d, Lp, Lh, D, itemsize) > budget_bytes:
            continue
        best = d
    return best


def local_inference_layer(p, h):
    """Pallas implementation of LocalInference_Layer.forward(p, h)."""
    B, Lp, D = p.shape
    Bh, Lh, Dh = h.shape
    assert B == Bh and D == Dh

    phys_vmem = _tpu_vmem_bytes()
    tile_budget = phys_vmem // 4            # ~16 MiB on v7x, ~32 MiB on v5e/v6e
    vmem_cap = (phys_vmem * 3) // 4         # ~48 MiB on v7x, ~96 MiB on v5e/v6e

    bt = _pick_batch_tile(B, Lp, Lh, D, p.dtype.itemsize, tile_budget)
    est = _per_step_vmem_bytes(bt, Lp, Lh, D, p.dtype.itemsize)

    # Raise the scoped-VMEM limit above the generation-dependent default only
    # when the per-step footprint needs it; never request physical capacity.
    vmem_limit = None
    if est > 16 * 2**20:
        vmem_limit = int(min(max(2 * est, 32 * 2**20), vmem_cap))

    out_shapes = (
        jax.ShapeDtypeStruct((B, Lp, 4 * D), p.dtype),
        jax.ShapeDtypeStruct((B, Lh, 4 * D), h.dtype),
    )

    grid_spec = pltpu.PrefetchScalarGridSpec(
        num_scalar_prefetch=0,
        grid=(B // bt,),
        in_specs=[
            pl.BlockSpec((bt, Lp, D), lambda b: (b, 0, 0)),
            pl.BlockSpec((bt, Lh, D), lambda b: (b, 0, 0)),
        ],
        out_specs=[
            pl.BlockSpec((bt, Lp, 4 * D), lambda b: (b, 0, 0)),
            pl.BlockSpec((bt, Lh, 4 * D), lambda b: (b, 0, 0)),
        ],
    )

    return pl.pallas_call(
        _local_inference_kernel,
        out_shape=out_shapes,
        grid_spec=grid_spec,
        compiler_params=pltpu.CompilerParams(
            dimension_semantics=("parallel",),
            vmem_limit_bytes=vmem_limit),
    )(p, h)


def _reference(p, h):
    """Plain-JAX reference mirroring the PyTorch forward exactly."""
    e = jnp.einsum("bpd,bhd->bph", p, h)
    p_score = jax.nn.softmax(e, axis=2)   # softmax2
    h_score = jax.nn.softmax(e, axis=1)   # softmax1
    p_ = jnp.einsum("bph,bhd->bpd", p_score, h)
    h_ = jnp.einsum("bph,bpd->bhd", h_score, p)
    m_p = jnp.concatenate((p, p_, p - p_, p * p_), axis=2)
    m_h = jnp.concatenate((h, h_, h - h_, h * h_), axis=2)
    return m_p, m_h


if __name__ == "__main__":
    key = jax.random.PRNGKey(0)

    # Case 1: asymmetric seq lengths (Lp != Lh), one batch element per step.
    # Case 2: B=4 exercises the batch-packing / fori_loop path (bt=2).
    for (B, Lp, Lh, D) in ((2, 8, 16, 32), (4, 8, 8, 32)):
        key, kp, kh = jax.random.split(key, 3)
        p = jax.random.normal(kp, (B, Lp, D), dtype=jnp.float32)
        h = jax.random.normal(kh, (B, Lh, D), dtype=jnp.float32)

        m_p, m_h = local_inference_layer(p, h)
        jax.block_until_ready((m_p, m_h))

        m_p_ref, m_h_ref = _reference(p, h)
        assert m_p.shape == (B, Lp, 4 * D) and m_h.shape == (B, Lh, 4 * D)
        assert jnp.allclose(m_p, m_p_ref, atol=1e-5, rtol=1e-5)
        assert jnp.allclose(m_h, m_h_ref, atol=1e-5, rtol=1e-5)

    print("KERNEL_OK")
</pallas_src>

<mosaic_0001>
module attributes {stable_mosaic.version = 11 : i64} {
  func.func @_local_inference_kernel(%arg0: i32, %arg1: memref<1x8x32xf32, #tpu.memory_space<vmem>>, %arg2: memref<1x16x32xf32, #tpu.memory_space<vmem>>, %arg3: memref<1x8x128xf32, #tpu.memory_space<vmem>>, %arg4: memref<1x16x128xf32, #tpu.memory_space<vmem>>) attributes {dimension_semantics = [#tpu.dimension_semantics<parallel>], iteration_bounds = array<i64: 2>, scalar_prefetch = 0 : i64, scratch_operands = 0 : i64, tpu.core_type = #tpu.core_type<tc>, window_params = [{transform_indices = @transform_0, window_bounds = array<i64: 1, 8, 32>}, {transform_indices = @transform_1, window_bounds = array<i64: 1, 16, 32>}, {transform_indices = @transform_2, window_bounds = array<i64: 1, 8, 128>}, {transform_indices = @transform_3, window_bounds = array<i64: 1, 16, 128>}]} {
    %cst = arith.constant 1.000000e+00 : f32
    %0 = vector.broadcast %cst : f32 to vector<8x1xf32>
    %c0 = arith.constant 0 : index
    %c0_0 = arith.constant 0 : index
    %c0_1 = arith.constant 0 : index
    %1 = vector.load %arg1[%c0, %c0_0, %c0_1] : memref<1x8x32xf32, #tpu.memory_space<vmem>>, vector<1x8x32xf32>
    %2 = vector.shape_cast %1 : vector<1x8x32xf32> to vector<8x32xf32>
    %c0_2 = arith.constant 0 : index
    %c0_3 = arith.constant 0 : index
    %c0_4 = arith.constant 0 : index
    %3 = vector.load %arg2[%c0_2, %c0_3, %c0_4] : memref<1x16x32xf32, #tpu.memory_space<vmem>>, vector<1x16x32xf32>
    %4 = vector.shape_cast %3 : vector<1x16x32xf32> to vector<16x32xf32>
    %cst_5 = arith.constant dense<0.000000e+00> : vector<8x16xf32>
    %5 = tpu.matmul %2, %4, %cst_5 {dimension_numbers = #tpu.dot_dimension_numbers<[1], [1], [0], [0], [0, 0, 1, 0], [], []>} : vector<8x32xf32>, vector<16x32xf32>, vector<8x16xf32> -> vector<8x16xf32>
    %cst_6 = arith.constant dense<0xFF800000> : vector<8xf32>
    %6 = vector.multi_reduction <maximumf>, %5, %cst_6 [1] : vector<8x16xf32> to vector<8xf32>
    %7 = vector.shape_cast %6 : vector<8xf32> to vector<8x1xf32>
    %cst_7 = arith.constant dense<0xFF800000> : vector<16xf32>
    %8 = vector.multi_reduction <maximumf>, %5, %cst_7 [0] : vector<8x16xf32> to vector<16xf32>
    %9 = vector.shape_cast %8 : vector<16xf32> to vector<1x16xf32>
    %10 = vector.broadcast %7 : vector<8x1xf32> to vector<8x16xf32>
    %11 = arith.subf %5, %10 : vector<8x16xf32>
    %12 = math.exp %11 : vector<8x16xf32>
    %13 = vector.broadcast %9 : vector<1x16xf32> to vector<8x16xf32>
    %14 = arith.subf %5, %13 : vector<8x16xf32>
    %15 = math.exp %14 : vector<8x16xf32>
    %cst_8 = arith.constant dense<0.000000e+00> : vector<8xf32>
    %16 = vector.multi_reduction <add>, %12, %cst_8 [1] : vector<8x16xf32> to vector<8xf32>
    %17 = vector.shape_cast %16 : vector<8xf32> to vector<8x1xf32>
    %cst_9 = arith.constant dense<0.000000e+00> : vector<16x1xf32>
    %18 = tpu.matmul %15, %0, %cst_9 {dimension_numbers = #tpu.dot_dimension_numbers<[0], [0], [1], [1], [0, 1, 1, 1], [], []>} : vector<8x16xf32>, vector<8x1xf32>, vector<16x1xf32> -> vector<16x1xf32>
    %cst_10 = arith.constant dense<0.000000e+00> : vector<8x32xf32>
    %19 = tpu.matmul %12, %4, %cst_10 {dimension_numbers = #tpu.dot_dimension_numbers<[1], [0], [0], [1], [0, 0, 1, 1], [], []>} : vector<8x16xf32>, vector<16x32xf32>, vector<8x32xf32> -> vector<8x32xf32>
    %20 = tpu.reciprocal %17 : vector<8x1xf32> -> vector<8x1xf32>
    %21 = vector.broadcast %20 : vector<8x1xf32> to vector<8x32xf32>
    %22 = arith.mulf %19, %21 : vector<8x32xf32>
    %cst_11 = arith.constant dense<0.000000e+00> : vector<16x32xf32>
    %23 = tpu.matmul %15, %2, %cst_11 {dimension_numbers = #tpu.dot_dimension_numbers<[0], [0], [1], [1], [0, 1, 1, 1], [], []>} : vector<8x16xf32>, vector<8x32xf32>, vector<16x32xf32> -> vector<16x32xf32>
    %24 = tpu.reciprocal %18 : vector<16x1xf32> -> vector<16x1xf32>
    %25 = vector.broadcast %24 : vector<16x1xf32> to vector<16x32xf32>
    %26 = arith.mulf %23, %25 : vector<16x32xf32>
    %27 = arith.subf %2, %22 : vector<8x32xf32>
    %28 = arith.mulf %2, %22 : vector<8x32xf32>
    %29 = tpu.concatenate %2, %22, %27, %28 in 1 : vector<8x32xf32>, vector<8x32xf32>, vector<8x32xf32>, vector<8x32xf32> -> vector<8x128xf32>
    %c0_12 = arith.constant 0 : index
    %c0_13 = arith.constant 0 : index
    %c0_14 = arith.constant 0 : index
    %30 = vector.load %arg3[%c0_12, %c0_13, %c0_14] : memref<1x8x128xf32, #tpu.memory_space<vmem>>, vector<1x8x128xf32>
    %31 = vector.shape_cast %30 : vector<1x8x128xf32> to vector<8x128xf32>
    %32 = vector.shape_cast %29 : vector<8x128xf32> to vector<1x8x128xf32>
    tpu.vector_store %arg3[%c0_12, %c0_13, %c0_14], %32 {strides = array<i32>} : memref<1x8x128xf32, #tpu.memory_space<vmem>>, vector<1x8x128xf32>,
    %33 = arith.subf %4, %26 : vector<16x32xf32>
    %34 = arith.mulf %4, %26 : vector<16x32xf32>
    %35 = tpu.concatenate %4, %26, %33, %34 in 1 : vector<16x32xf32>, vector<16x32xf32>, vector<16x32xf32>, vector<16x32xf32> -> vector<16x128xf32>
    %c0_15 = arith.constant 0 : index
    %c0_16 = arith.constant 0 : index
    %c0_17 = arith.constant 0 : index
    %36 = vector.load %arg4[%c0_15, %c0_16, %c0_17] : memref<1x16x128xf32, #tpu.memory_space<vmem>>, vector<1x16x128xf32>
    %37 = vector.shape_cast %36 : vector<1x16x128xf32> to vector<16x128xf32>
    %38 = vector.shape_cast %35 : vector<16x128xf32> to vector<1x16x128xf32>
    tpu.vector_store %arg4[%c0_15, %c0_16, %c0_17], %38 {strides = array<i32>} : memref<1x16x128xf32, #tpu.memory_space<vmem>>, vector<1x16x128xf32>,
    return
  }
  func.func @transform_0(%arg0: i32) -> (i32, i32, i32) {
    %c0_i32 = arith.constant 0 : i32
    %c0_i32_0 = arith.constant 0 : i32
    %c0_i32_1 = arith.constant 0 : i32
    return %arg0, %c0_i32, %c0_i32_0 : i32, i32, i32
  }
  func.func @transform_1(%arg0: i32) -> (i32, i32, i32) {
    %c0_i32 = arith.constant 0 : i32
    %c0_i32_0 = arith.constant 0 : i32
    %c0_i32_1 = arith.constant 0 : i32
    return %arg0, %c0_i32, %c0_i32_0 : i32, i32, i32
  }
  func.func @transform_2(%arg0: i32) -> (i32, i32, i32) {
    %c0_i32 = arith.constant 0 : i32
    %c0_i32_0 = arith.constant 0 : i32
    %c0_i32_1 = arith.constant 0 : i32
    return %arg0, %c0_i32, %c0_i32_0 : i32, i32, i32
  }
  func.func @transform_3(%arg0: i32) -> (i32, i32, i32) {
    %c0_i32 = arith.constant 0 : i32
    %c0_i32_0 = arith.constant 0 : i32
    %c0_i32_1 = arith.constant 0 : i32
    return %arg0, %c0_i32, %c0_i32_0 : i32, i32, i32
  }
}

</mosaic_0001>

<bundles_post_ra>
// kernel: tpu_custom_call.1
= control target key start
LH: loop header
LB: loop body
LE: loop exit
PB: predicated region body
PF: predicated region fallthrough
CT: control target
= control target key end

     0   :  { %9 = vsyncpa [#allocation3], 0  ;;  %s1454_s0 = inlined_call_operand.hbm [shape: f32[2,8,32], index: 0, kind: input, shape index: {}]   ;;  %s1455_s1 = inlined_call_operand.hbm [shape: f32[2,16,32], index: 1, kind: input, shape index: {}]   ;;  %s1456_s2 = inlined_call_operand.hbm [shape: f32[2,8,128], index: 2, kind: output, shape index: {0}]   ;;  %s1457_s3 = inlined_call_operand.hbm [shape: f32[2,16,128], index: 3, kind: output, shape index: {1}]  }
   0x1   :  { %11 = vsyncpa [#allocation3 + $0x1], 0 }
   0x2   :  { %12 = vsyncpa [#allocation6], 0 }
   0x3   :  { %14 = vsyncpa [#allocation6 + $0x1], 0 }
   0x4   :  { %15 = vsyncpa [#allocation4], 0 }
   0x5   :  { %17 = vsyncpa [#allocation4 + $0x1], 0 }
   0x6   :  { %18 = vsyncpa [#allocation9], 0 }
   0x7   :  { %20 = vsyncpa [#allocation9 + $0x1], 0  ;;  %s1169_s12 = smov 0   ;;  %s1171_s13 = smov 0  }
   0x8   :  { %s1173_s14 = smov 0   ;;  %s1175_s15 = smov 0  }
   0x9 LB: > { %s1190_s16 = sadd.s32 4294967295, %s1132_s15   ;;  %s833_s17 = sadd.s32 4294967294, %s1132_s15   ;;  %s1132_s15 = sphi %s1175_s15, %s1475_s15   ;;  %s1128_s14 = sphi %s1173_s14, %s1474_s14   ;;  %s1124_s13 = sphi %s1171_s13, %s1473_s13   ;;  %s1120_s12 = sphi %s1169_s12, %s1472_s12  }
   0xa   : > { %s1194_s18 = sadd.s32 1, %s1132_s15   ;;  %s33_s19 = sadd.s32 1, %s1128_s14 }
   0xb   : > { %s30_s20 = ssub.s32 %s1132_s15, %s1194_s18  ;;  %p40_p0 = scmp.ne.s32.totalorder %s1128_s14, %s1124_s13 }
   0xc   : > { %p31_p1 = scmp.eq.s32.totalorder %s30_s20, 0  ;;  %p41_p2 = scmp.eq.s32.totalorder %s1132_s15, 0 }
   0xd   : > { %p46_p3 = scmp.ne.s32.totalorder %s1124_s13, %s1120_s12  ;;  %p47_p4 = scmp.eq.s32.totalorder %s1190_s16, 0 }
   0xe   : > { %s1206_s21 = scalar_select %p31_p1, %s1128_s14, %s33_s19  }
   0xf   : > { %p1208_p5 = por %p41_p2, %p40_p0  ;;  %p1212_p6 = por %p47_p4, %p46_p3 }
  0x10   : > { %p96_p7 = scmp.eq.s32.totalorder %s1190_s16, 1  ;;  %p102_p8 = scmp.eq.s32.totalorder %s833_s17, 1 }
  0x11   : > { %s1461_s23 = scalar_select %p1212_p6, 1, 0 }
  0x12   : > { %p921_p10 = scmp.lt.s32.totalorder %s1132_s15, 2  ;;  %p1219_p11 = por %p96_p7, %p40_p0 }
  0x13   : > { %p1223_p12 = por %p102_p8, %p46_p3  ;;  %s1228_s26 = sand.u32 1, %s1128_s14  }
  0x14   : > { %s1462_s24 = scalar_select %p1219_p11, 1, 0 }
  0x15   : > { %s1463_s25 = scalar_select %p1223_p12, 1, 0 }
  0x16   : > { %s837_s27 = sshll.u32 %s1132_s15, 7  ;;  %s836_s28 = sshll.u32 %s1228_s26, 3 }
  0x17   : > { %s1235_s4 = scalar_lea.hbm %s1454_s0, %s837_s27  ;;  %s152_s5 = scalar_lea.vmem [#allocation2], %s836_s28 }
  0x18   : > { %s159_s6 = sshll.u32 %s152_s5, 4  ;;  %p1239_p13 = pnand %p921_p10, %p1208_p5  ;;  %s1243_s6 = int_to_ptr.vmem [resolvable:$true] %s159_s6 }
  0x19   : > { %s149_s8 = scalar_lea.sflag [#allocation3], %s1228_s26  ;;  %s978_s9 = scalar_lea.hbm %s1235_s4, 128 }
  0x1a   : > { %p979_p2 = scmp.ne.s32.totalorder %s1235_s4, %s978_s9  ;;  %p980_p3 = pneg %p1239_p13 }
  0x1b   : > { %s983_s17 = scalar_lea.hbm %s1454_s0, 256  ;;  %p984_p5 = scmp.lt.s32.totalorder %s1235_s4, %s1454_s0 }
  0x1c   : > { %p981_p4 = pnand %p980_p3, %p979_p2  ;;  %p985_p8 = scmp.lt.s32.totalorder %s983_s17, %s978_s9 }
  0x1e   : > { %p982_p7 = pneg %p981_p4  ;;  %p986_p10 = por %p985_p8, %p984_p5 }
  0x20   : > { %p987_p9 = pnand %p986_p10, %p982_p7 }
  0x22   : > { %990 = shalt.err (!%p987_p9)
}
  0x23   : > { %s991_s22 = scalar_lea.vmem %s1243_s6, 128  ;;  %s1134_s27 = smov [#allocation2]  }
  0x24   : > { %p992_p0 = scmp.ne.s32.totalorder %s1243_s6, %s991_s22  ;;  %s996_s28 = sshll.u32 %s1134_s27, 4  ;;  %s997_s28 = int_to_ptr.vmem [resolvable:$false] %s996_s28 }
  0x25   : > { %s998_s29 = scalar_lea.vmem %s997_s28, 256  ;;  %p999_p1 = scmp.lt.s32.totalorder %s1243_s6, %s997_s28 }
  0x26   : > { %p994_p2 = pnand %p992_p0, %p980_p3  ;;  %p1000_p12 = scmp.lt.s32.totalorder %s998_s29, %s991_s22 }
  0x28   : > { %p995_p4 = pneg %p994_p2  ;;  %p1001_p11 = por %p1000_p12, %p999_p1 }
  0x2a   : > { %p1002_p5 = pnand %p1001_p11, %p995_p4 }
  0x2c   : > { %1005 = shalt.err (!%p1002_p5)
}
  0x2d   : > { %910 = dma.hbm_to_vmem [thread:$0]  (!%p1239_p13), %s1235_s4, 128, %s1243_s6, %s149_s8  }
  0x2e   : > { %p1465_p9 = scmp.lt.s32.totalorder %s1132_s15, 3  ;;  %p1466_p0 = scmp.ge.s32.totalorder %s1132_s15, 1 }
  0x2f   : > { %s838_s5 = sshll.u32 %s1228_s26, 4  ;;  %s861_s9 = sshll.u32 %s1132_s15, 8 }
  0x30   : > { %p1276_p7 = pnand %p1466_p0, %p1465_p9  ;;  %s1285_s17 = scalar_lea.hbm %s1455_s1, %s861_s9 }
  0x31   : > { %s170_s19 = scalar_lea.vmem [#allocation5], %s838_s5  ;;  %s167_s4 = scalar_lea.sflag [#allocation6], %s1228_s26 }
  0x32   : > { %s177_s20 = sshll.u32 %s170_s19, 4  ;;  %s1006_s6 = scalar_lea.hbm %s1285_s17, 256  ;;  %s1287_s20 = int_to_ptr.vmem [resolvable:$true] %s177_s20 }
  0x33   : > { %p1007_p11 = scmp.ne.s32.totalorder %s1285_s17, %s1006_s6  ;;  %s1011_s27 = scalar_lea.hbm %s1455_s1, 512 }
  0x34   : > { %p1012_p8 = scmp.lt.s32.totalorder %s1285_s17, %s1455_s1  ;;  %p1013_p10 = scmp.lt.s32.totalorder %s1011_s27, %s1006_s6 }
  0x35   : > { %p1009_p12 = pnand %p1007_p11, %p980_p3 }
  0x36   : > { %p1014_p2 = por %p1013_p10, %p1012_p8 }
  0x37   : > { %p1010_p1 = pneg %p1009_p12 }
  0x39   : > { %p1015_p4 = pnand %p1014_p2, %p1010_p1 }
  0x3b   : > { %1018 = shalt.err (!%p1015_p4)
}
  0x3c   : > { %s1019_s5 = scalar_lea.vmem %s1287_s20, 256  ;;  %s1135_s9 = smov [#allocation5]  }
  0x3d   : > { %p1020_p5 = scmp.ne.s32.totalorder %s1287_s20, %s1019_s5  ;;  %s1024_s10 = sshll.u32 %s1135_s9, 4  ;;  %s1025_s10 = int_to_ptr.vmem [resolvable:$false] %s1024_s10 }
  0x3e   : > { %s1026_s11 = scalar_lea.vmem %s1025_s10, 512  ;;  %p1027_p11 = scmp.lt.s32.totalorder %s1287_s20, %s1025_s10 }
  0x3f   : > { %p1022_p9 = pnand %p1020_p5, %p980_p3  ;;  %p1028_p12 = scmp.lt.s32.totalorder %s1026_s11, %s1019_s5 }
  0x41   : > { %p1023_p0 = pneg %p1022_p9  ;;  %p1029_p6 = por %p1028_p12, %p1027_p11 }
  0x43   : > { %p1030_p8 = pnand %p1029_p6, %p1023_p0 }
  0x45   : > { %1033 = shalt.err (!%p1030_p8)
}
  0x46   : > { %s1136_s19 = smov 128   ;;  %s1137_s6 = smov 8  }
  0x47   : > { %913 = dma.hbm_to_vmem [thread:$0]  (!%p1239_p13), %s1285_s17, 256, %s1287_s20, %s167_s4, %s1136_s19, %s1136_s19, %s1137_s6  }
  0x48   : > { %189 = sbr.rel (%p1276_p7) target bundleno = 928 (0x3a0), region = 28  ;;  %s1317_s8 = sand.u32 (!%p1276_p7), 1, %s1124_s13  }
  0x49   : > { %s842_s22 = sshll.u32 (!%p1276_p7), %s1317_s8, 3  ;;  %s192_s27 = scalar_lea.sflag (!%p1276_p7), [#allocation3], %s1317_s8 }
  0x4a   : > { %s195_s28 = scalar_lea.vmem (!%p1276_p7), [#allocation2], %s842_s22  ;;  %p1468_p6 = scmp.ne.s32.totalorder (!%p1276_p7), %s1461_s23, 0 }
  0x4d   : > { %1103 = dma.done.wait (%p1468_p6), %s192_s27, 128  }
  0x4e   : > { %1105 = vsyncadd (%p1468_p6), %s192_s27, 4294967168  ;;  %s843_s26 = sshll.u32 %s1317_s8, 4  ;;  %s201_s7 = scalar_lea.sflag [#allocation6], %s1317_s8 }
  0x4f   : > { %s204_s30 = scalar_lea.vmem [#allocation5], %s843_s26 }
  0x50   : > { %1107 = dma.done.wait (%p1468_p6), %s201_s7, 256  }
  0x51   : > { %1109 = vsyncadd (%p1468_p6), %s201_s7, 4294967040  ;;  %v1138_v0 = vmov 0.0   ;;  %vm1139_vm0 = vmmov 0   ;;  %vm240_vm1 = vcmask 261120   ;;  %v1336_v1 = vld [vmem:[%s204_s30 + $0x8] sm:$0xff]  ;;  %v1340_v2 = vld [vmem:[%s204_s30] sm:$0xff] }
  0x52   : > { %875 = vmatprep.subr.mxu0 %v1138_v0  ;;  %879 = vmatprep.mubr.msk.f32.mxu0 %vm1139_vm0, %v1138_v0  ;;  %v1344_v3 = vld [vmem:[%s195_s28] sm:$0xff]  ;;  %vm320_vm2 = vcmask 130048   ;;  %v1140_v15 = vmov 1.0   ;;  %vm371_vm3 = vcmask 64512   ;;  %v1141_v22 = vmov 0   ;;  %s1142_s23 = smov 32  }
  0x53   : > { %876 = vmatpush3.xpose.msk.msra.mxu0 %vm240_vm1, %v1336_v1  ;;  %882 = vmatprep.subr.mxu1 %v1140_v15  ;;  %s1143_s17 = smov 64   ;;  %s1144_s20 = smov 96   ;;  %vm632_vm4 = vcmask 523264   ;;  %vm634_vm5 = vcmask 785408  }
  0x54   : > { %877 = vmatprep.subr.mxu0 %v1138_v0  ;;  %883 = vmatpush3.msra.mxu1 %v1140_v15  ;;  %s856_s4 = sshll.u32 %s1190_s16, 7  ;;  %s229_s29 = scalar_lea.vmem [#allocation7], %s842_s22 }
  0x55   : > { %887 = vmatprep.subr.mxu1 %v1138_v0  ;;  %966 = vset.pattern.permute.xlu1 %v1141_v22  ;;  %s692_s5 = sshll.u32 %s229_s29, 4  ;;  %s1375_s11 = scalar_lea.hbm %s1456_s2, %s856_s4  ;;  %s693_s5 = int_to_ptr.vmem [resolvable:$true] %s692_s5 }
  0x56   : > { %s674_s19 = scalar_lea.sflag [#allocation4], %s1317_s8  ;;  %s1034_s6 = scalar_lea.vmem %s693_s5, 128 }
  0x57   : > { %878 = vmatpush3.xpose.msk.msra.mxu0 %vm240_vm1, %v1340_v2  ;;  %p1035_p13 = scmp.ne.s32.totalorder %s693_s5, %s1034_s6  ;;  %p1469_p3 = scmp.ne.s32.totalorder %s1462_s24, 0 }
  0x58   : > { %s1145_s22 = smov [#allocation7]  }
  0x59   : > { %p1036_p7 = pnand %p1035_p13, %p1469_p3  ;;  %s1038_s27 = sshll.u32 %s1145_s22, 4  ;;  %s1039_s27 = int_to_ptr.vmem [resolvable:$false] %s1038_s27 }
  0x5a   : > { %880 = vmatmul.mubr.msk.f32.vlgmr.msra.gmra.mxu0 %vm240_vm1, %v1344_v3  ;;  %s1040_s28 = scalar_lea.vmem %s1039_s27, 256  ;;  %p1041_p10 = scmp.lt.s32.totalorder %s693_s5, %s1039_s27 }
  0x5b   : > { %p1037_p1 = pneg %p1036_p7  ;;  %p1042_p2 = scmp.lt.s32.totalorder %s1040_s28, %s1034_s6 }
  0x5d   : > { %p1043_p4 = por %p1042_p2, %p1041_p10 }
  0x5f   : > { %p1044_p5 = pnand %p1043_p4, %p1037_p1 }
 0x11a   : > { %v316_v4 = vpop.f32.mrf.mxu0 }
 0x11b   : > { %v321_v5 = vsel %vm320_vm2, %v316_v4, -inf }
 0x11c   : > { %v324_v6 = vrot.slane %v321_v5, 4  ;;  %v881_v7 = vpop.f32.mrf.mxu0 }
 0x11e   : > { %v325_v8 = vmax.f32 %v321_v5, %v324_v6 }
 0x120   : > { %v326_v9 = vrot.slane %v325_v8, 2 }
 0x122   : > { %v327_v10 = vmax.f32 %v325_v8, %v326_v9 }
 0x124   : > { %v328_v11 = vrot.slane %v327_v10, 1 }
 0x126   : > { %v329_v12 = vmax.f32 %v327_v10, %v328_v11 }
 0x128   : > { %v333_v13 = vsub.f32 %v316_v4, %v329_v12 }
 0x12a   : > { %v334_v14 = vmul.f32 1.442695, %v333_v13 }
 0x12c   : > { %968 = vpow2.f32 %v334_v14 }
 0x139   : > { %v969_v16 = vpop.eup %968 }
 0x13a   : > { %339 = vxpose.xlu0.b32.start.end [1/1] (short) (narrow) %v969_v16, 16 }
 0x163   : > { %967 = vset.pattern.permute.xlu0 %v1141_v22 }
 0x16b   : > { %322 = vmax.xlane.f32.xlu0 %v321_v5 }
 0x1b6   : > { %v355_v17 = vpop.trf.xlu0 }
 0x1b7   : > { %884 = vmatprep.mubr.msk.f32.mxu1 %vm371_vm3, %v355_v17 }
 0x1ba   : > { %v356_v18 = vpop.trf.xlu0 }
 0x1bb   : > { %885 = vmatmul.mubr.msk.f32.vlgmr.msra.gmra.mxu1 %vm371_vm3, %v356_v18 }
 0x1bc   : > { %888 = vmatpush3.msra.mxu1 %v1336_v1  ;;  %891 = vmatprep.mubr.msk.f32.mxu1 %vm1139_vm0, %v1138_v0 }
 0x1bd   : > { %889 = vmatprep.subr.mxu1 %v1138_v0 }
 0x1be   : > { %890 = vmatpush3.msra.mxu1 %v1340_v2 }
 0x1bf   : > { %894 = vmatprep.subr.mxu1 %v1344_v3 }
 0x1f4   : > { %v323_v19 = vpop.xlane.xlu0 %322 }
 0x1f5   : > { %v330_v20 = vsub.f32 %v316_v4, %v323_v19 }
 0x1f7   : > { %v331_v21 = vmul.f32 1.442695, %v330_v20 }
 0x1f9   : > { %970 = vpow2.f32 %v331_v21 }
 0x206   : > { %v971_v23 = vpop.eup %970 }
 0x207   : > { %892 = vmatmul.mubr.msk.f32.vlgmr.msra.gmra.mxu1 %vm320_vm2, %v971_v23  ;;  %v336_v24 = vsel %vm320_vm2, %v971_v23, 0.0 }
 0x208   : > { %896 = vmatprep.mubr.msk.f32.mxu1 %vm371_vm3, %v355_v17  ;;  %337 = vadd.xlane.f32.xlu1 %v336_v24 }
 0x209   : > { %895 = vmatpush3.msra.mxu1 %v1344_v3 }
 0x20b   : > { %897 = vmatmul.mubr.msk.f32.vlgmr.msra.gmra.mxu1 %vm371_vm3, %v356_v18 }
 0x27b   : > { %v886_v25 = vpop.f32.mrf.mxu1 }
 0x27d   : > { %v444_v26 = vpop.f32.mrf.mxu1 }
 0x27e   : > { %972 = vrcp.f32 %v444_v26 }
 0x27f   : > { %974 = vrcp.f32 %v886_v25 }
 0x28b   : > { %v973_v27 = vpop.eup %972 }
 0x28c   : > { %607 = vperm.xlu1 %966, %v973_v27   ;;  %v975_v28 = vpop.eup %974 }
 0x290   : > { %612 = vperm.xlu1 %966, %v975_v28  }
 0x291   : > { %v338_v29 = vpop.xlane.xlu1 %337 }
 0x292   : > { %976 = vrcp.f32 %v338_v29 }
 0x29f   : > { %v977_v30 = vpop.eup %976 }
 0x2c7   : > { %v522_v31 = vpop.f32.mrf.mxu1 }
 0x2c8   : > { %v527_v32 = vmul.f32 %v977_v30, %v522_v31 }
 0x2c9   : > { %v893_v33 = vpop.f32.mrf.mxu1 }
 0x2ca   : > { %620 = vrot.lane.b32.xlu1 %v527_v32, %s1142_s23  ;;  %v617_v34 = vsub.f32 %v1344_v3, %v527_v32  ;;  %v618_v35 = vmul.f32 %v527_v32, %v1344_v3 }
 0x2cb   : > { %v898_v36 = vpop.f32.mrf.mxu1 }
 0x2cd   : > { %v594_v37 = vpop.f32.mrf.mxu1 }
 0x2ce   : > { %624 = vrot.lane.b32.xlu1 %v617_v34, %s1143_s17 }
 0x2d2   : > { %628 = vrot.lane.b32.xlu1 %v618_v35, %s1144_s20 }
 0x307   : > { %v608_v38 = vpop.permute.xlu1 %607 }
 0x308   : > { %v615_v39 = vmul.f32 %v608_v38, %v594_v37 }
 0x30a   : > { %v639_v40 = vmul.f32 %v615_v39, %v1340_v2  ;;  %v637_v44 = vsub.f32 %v1340_v2, %v615_v39 }
 0x30b   : > { %v613_v41 = vpop.permute.xlu1 %612 }
 0x30c   : > { %v616_v42 = vmul.f32 %v898_v36, %v613_v41  ;;  %659 = vrot.lane.b32.xlu0 %v639_v40, %s1144_s20 }
 0x30e   : > { %645 = vrot.lane.b32.xlu1 %v616_v42, %s1142_s23  ;;  %v638_v43 = vsub.f32 %v1336_v1, %v616_v42  ;;  %v640_v45 = vmul.f32 %v616_v42, %v1336_v1 }
 0x312   : > { %643 = vrot.lane.b32.xlu1 %v615_v39, %s1142_s23 }
 0x316   : > { %653 = vrot.lane.b32.xlu1 %v638_v43, %s1143_s17 }
 0x31a   : > { %651 = vrot.lane.b32.xlu1 %v637_v44, %s1143_s17 }
 0x31e   : > { %661 = vrot.lane.b32.xlu1 %v640_v45, %s1144_s20 }
 0x33c   : > { %v621_v46 = vpop.permute.xlu1 %620 }
 0x33d   : > { %v631_v48 = vsel %vm240_vm1, %v1344_v3, %v621_v46 }
 0x340   : > { %v625_v47 = vpop.permute.xlu1 %624 }
 0x341   : > { %v633_v49 = vsel %vm632_vm4, %v631_v48, %v625_v47 }
 0x344   : > { %v629_v50 = vpop.permute.xlu1 %628 }
 0x345   : > { %v635_v51 = vsel %vm634_vm5, %v633_v49, %v629_v50 }
 0x346   : > { %636 = vst [vmem:[%s229_s29] sm:$0xff] %v635_v51 }
 0x347   : > { %1047 = shalt.err (!%p1044_p5)
}
 0x348   : > { %s1048_s7 = scalar_lea.hbm %s1375_s11, 128  ;;  %s1052_s17 = scalar_lea.hbm %s1456_s2, 256 }
 0x349   : > { %p1049_p9 = scmp.ne.s32.totalorder %s1375_s11, %s1048_s7  ;;  %p1053_p12 = scmp.lt.s32.totalorder %s1375_s11, %s1456_s2 }
 0x34a   : > { %p1054_p8 = scmp.lt.s32.totalorder %s1052_s17, %s1048_s7 }
 0x34b   : > { %p1050_p0 = pnand %p1049_p9, %p1469_p3 }
 0x34c   : > { %p1055_p6 = por %p1054_p8, %p1053_p12 }
 0x34d   : > { %p1051_p11 = pneg %p1050_p0 }
 0x34f   : > { %p1056_p13 = pnand %p1055_p6, %p1051_p11 }
 0x351   : > { %1059 = shalt.err (!%p1056_p13)
}
 0x352   : > { %903 = dma.vmem_to_hbm [thread:$0]  (%p1469_p3), %s693_s5, 128, %s1375_s11, %s674_s19  }
 0x353   : > { %s236_s29 = scalar_lea.vmem [#allocation8], %s843_s26  ;;  %s862_s10 = sshll.u32 %s1190_s16, 8 }
 0x354   : > { %s705_s9 = sshll.u32 %s236_s29, 4  ;;  %s1410_s11 = scalar_lea.hbm %s1457_s3, %s862_s10  ;;  %s1401_s9 = int_to_ptr.vmem [resolvable:$true] %s705_s9 }
 0x355   : > { %s679_s16 = scalar_lea.sflag [#allocation9], %s1317_s8  ;;  %s1060_s19 = scalar_lea.vmem %s1401_s9, 256 }
 0x356   : > { %p1061_p7 = scmp.ne.s32.totalorder %s1401_s9, %s1060_s19  ;;  %s1146_s6 = smov [#allocation8]  }
 0x357   : > { %s1064_s22 = sshll.u32 %s1146_s6, 4  ;;  %s1065_s22 = int_to_ptr.vmem [resolvable:$false] %s1064_s22 }
 0x358   : > { %p1062_p1 = pnand %p1061_p7, %p1469_p3  ;;  %s1066_s27 = scalar_lea.vmem %s1065_s22, 512 }
 0x359   : > { %p1067_p2 = scmp.lt.s32.totalorder %s1401_s9, %s1065_s22  ;;  %p1068_p4 = scmp.lt.s32.totalorder %s1066_s27, %s1060_s19 }
 0x35a   : > { %p1063_p10 = pneg %p1062_p1 }
 0x35b   : > { %p1069_p5 = por %p1068_p4, %p1067_p2 }
 0x35d   : > { %p1070_p9 = pnand %p1069_p5, %p1063_p10 }
 0x37e   : > { %v660_v57 = vpop.permute.xlu0 %659 }
 0x380   : > { %v646_v52 = vpop.permute.xlu1 %645 }
 0x381   : > { %v666_v60 = vsel %vm240_vm1, %v1336_v1, %v646_v52 }
 0x384   : > { %v644_v53 = vpop.permute.xlu1 %643 }
 0x385   : > { %v665_v55 = vsel %vm240_vm1, %v1340_v2, %v644_v53 }
 0x388   : > { %v654_v54 = vpop.permute.xlu1 %653 }
 0x389   : > { %v668_v61 = vsel %vm632_vm4, %v666_v60, %v654_v54 }
 0x38c   : > { %v652_v56 = vpop.permute.xlu1 %651 }
 0x38d   : > { %v667_v58 = vsel %vm632_vm4, %v665_v55, %v652_v56 }
 0x38e   : > { %v669_v59 = vsel %vm634_vm5, %v667_v58, %v660_v57 }
 0x38f   : > { %671 = vst [vmem:[%s236_s29] sm:$0xff] %v669_v59 }
 0x390   : > { %v662_v62 = vpop.permute.xlu1 %661 }
 0x391   : > { %v670_v63 = vsel %vm634_vm5, %v668_v61, %v662_v62 }
 0x392   : > { %672 = vst [vmem:[%s236_s29 + $0x8] sm:$0xff] %v670_v63 }
 0x393   : > { %1073 = shalt.err (!%p1070_p9)
}
 0x394   : > { %s1074_s28 = scalar_lea.hbm %s1410_s11, 256  ;;  %s1078_s23 = scalar_lea.hbm %s1457_s3, 512 }
 0x395   : > { %p1075_p0 = scmp.ne.s32.totalorder %s1410_s11, %s1074_s28  ;;  %p1079_p8 = scmp.lt.s32.totalorder %s1410_s11, %s1457_s3 }
 0x396   : > { %p1080_p6 = scmp.lt.s32.totalorder %s1078_s23, %s1074_s28 }
 0x397   : > { %p1076_p11 = pnand %p1075_p0, %p1469_p3 }
 0x398   : > { %p1081_p13 = por %p1080_p6, %p1079_p8 }
 0x399   : > { %p1077_p12 = pneg %p1076_p11 }
 0x39b   : > { %p1082_p7 = pnand %p1081_p13, %p1077_p12 }
 0x39d   : > { %1085 = shalt.err (!%p1082_p7)
}
 0x39e   : > { %s1147_s4 = smov 128   ;;  %s1148_s29 = smov 8  }
 0x39f   : > { %904 = dma.vmem_to_hbm [thread:$0]  (%p1469_p3), %s1401_s9, 256, %s1410_s11, %s679_s16, %s1147_s4, %s1147_s4, %s1148_s29  }
 0x3a0 PF: > { %s720_s10 = sand.u32 1, %s1120_s12   ;;  %p1470_p1 = scmp.ne.s32.totalorder %s1463_s25, 0 }
 0x3a1   : > { %p1471_p10 = scmp.ge.s32.totalorder %s1132_s15, 2  ;;  %s721_s26 = scalar_lea.sflag [#allocation4], %s720_s10 }
 0x3a3   : > { %p915_p2 = pnand %p1471_p10, %p1470_p1 }
 0x3a5   : > { %p916_p4 = pneg %p915_p2 }
 0x3a7   : > { %1111 = dma.done.wait (%p916_p4), %s721_s26, 128  }
 0x3a8   : > { %1113 = vsyncadd (%p916_p4), %s721_s26, 4294967168  ;;  %s730_s5 = scalar_lea.sflag [#allocation9], %s720_s10 }
 0x3a9   : > { %1115 = dma.done.wait (%p916_p4), %s730_s5, 256  }
 0x3aa   : > { %1117 = vsyncadd (%p916_p4), %s730_s5, 4294967040  ;;  %p23_p3 = scmp.ge.s32.totalorder %s1194_s18, 4   ;;  %s1472_s12 = smov %s1124_s13 }
 0x3ab   : > { %s1473_s13 = smov %s1128_s14  ;;  %s1474_s14 = smov %s1206_s21 }
 0x3ac   : > { %s1475_s15 = smov %s1194_s18  ;;  %25 = sbr.rel (!%p23_p3) target bundleno = 9 (0x9), region = 103 }
 0x3b1   :  { %735 = vsyncpa [#allocation3], 1 }
 0x3b2   :  { %737 = vsyncpa [#allocation3 + $0x1], 1 }
 0x3b3   :  { %738 = vsyncpa [#allocation6], 1 }
 0x3b4   :  { %740 = vsyncpa [#allocation6 + $0x1], 1 }
 0x3b5   :  { %741 = vsyncpa [#allocation4], 1 }
 0x3b6   :  { %743 = vsyncpa [#allocation4 + $0x1], 1 }
 0x3b7   :  { %744 = vsyncpa [#allocation9], 1 }
 0x3b8   :  { %746 = vsyncpa [#allocation9 + $0x1], 1 }

</bundles_post_ra>
